<compile_context>
chip_gen: v6e
topology: v6e:2x2x1
jax: 0.10.0
libtpu: 0.0.40
codegen_flags: <defaults>
</compile_context>

<pallas_src>
import functools
import math

import jax
import jax.numpy as jnp
from jax.experimental import pallas as pl
from jax.experimental.pallas import tpu as pltpu


_LANE = 128
_SUBLANE = 8
# Per input-block budget (bytes).  Inputs are double-buffered (2x), outputs
# are tiny, and there is no scratch accumulator anymore, so 2 x 4 MiB stays
# well inside scoped VMEM on v5e / v6e / v7x; vmem_limit_bytes below gives
# extra headroom for large channel counts.
_BLOCK_BYTES = 4 * 1024 * 1024
_VMEM_LIMIT = 32 * 1024 * 1024


def _choose_tiles(b, c, s, itemsize, block_bytes, allow_small_batch_tile):
    """Pick (batch tile, spatial tile).  Prefer wide lane-dense spatial tiles."""
    tb = _SUBLANE if b >= _SUBLANE else b
    s128 = pl.cdiv(s, _LANE) * _LANE

    def max_ts(tb_):
        return (block_bytes // max(1, tb_ * c * itemsize)) // _LANE * _LANE

    ts = min(s128, max(_LANE, max_ts(tb)))
    if allow_small_batch_tile:
        # Shrink the batch tile (down to 1) before letting the spatial tile
        # fall below 512 lanes: (TB, C, tS) blocks DMA as TB*C row segments of
        # tS*itemsize bytes, and wide segments keep the HBM DMA engines busy.
        while tb > 1 and ts < min(s128, 4 * _LANE):
            tb //= 2
            ts = min(s128, max(_LANE, max_ts(tb)))
    return int(tb), int(ts)


def _entropy_map_kernel(x_ref, o_ref, *, eps):
    # x_ref: (TB, C, tS) tile; o_ref: (TB, tS) tile.  reduction='none'.
    x = x_ref[...].astype(jnp.float32)
    e = x * jnp.log(x + eps)                      # VPU mul + EUP log
    o_ref[...] = (-jnp.sum(e, axis=1)).astype(o_ref.dtype)


def _entropy_block_sum_kernel(x_ref, o_ref, *, eps):
    # reduction='mean'/'sum': each grid step owns one block and reduces it
    # fully; the cross-lane reduce is hidden under the per-element EUP log.
    x = x_ref[...].astype(jnp.float32)
    total = jnp.sum(x * jnp.log(x + eps))
    o_ref[...] = jnp.broadcast_to(-total, o_ref.shape)


def entropy(x, reduction="mean", eps=1e-16):
    """Pallas implementation of Entropy.forward."""
    assert reduction in ("mean", "sum", "none")
    assert x.ndim >= 2
    b, c, *spatial = x.shape
    s = int(math.prod(spatial)) if spatial else 1
    count = b * s                                 # elements of e (for 'mean')
    x3 = x.reshape(b, c, s)                       # no wrapper-side dtype cast

    # Small-spatial remap: when S < 128 (e.g. plain (B, C) inputs) fold the
    # batch axis onto the lane axis instead of padding lanes 128x.
    if s < _LANE and b > 1:
        x3 = jnp.transpose(x3, (1, 0, 2)).reshape(1, c, b * s)
        bk, sk, swapped = 1, b * s, True
    else:
        bk, sk, swapped = b, s, False

    itemsize = jnp.dtype(x.dtype).itemsize
    tb, ts = _choose_tiles(bk, c, sk, itemsize, _BLOCK_BYTES,
                           allow_small_batch_tile=(reduction != "none"))
    bk_pad = pl.cdiv(bk, tb) * tb
    sk_pad = pl.cdiv(sk, ts) * ts
    if (bk_pad, sk_pad) != (bk, sk):
        # Zero padding contributes exactly 0 entropy (0 * log(eps) == 0).
        x3 = jnp.pad(x3, ((0, bk_pad - bk), (0, 0), (0, sk_pad - sk)))
    nb = bk_pad // tb
    ns = sk_pad // ts

    in_spec = pl.BlockSpec((tb, c, ts), lambda i, j: (i, 0, j))
    params = pltpu.CompilerParams(
        dimension_semantics=("parallel", "parallel"),
        vmem_limit_bytes=_VMEM_LIMIT)
    n_elem = bk_pad * c * sk_pad
    in_bytes = n_elem * itemsize

    if reduction == "none":
        out_bytes = bk_pad * sk_pad * itemsize
        out = pl.pallas_call(
            functools.partial(_entropy_map_kernel, eps=eps),
            out_shape=jax.ShapeDtypeStruct((bk_pad, sk_pad), x.dtype),
            grid_spec=pltpu.PrefetchScalarGridSpec(
                num_scalar_prefetch=0,
                grid=(nb, ns),
                in_specs=[in_spec],
                out_specs=pl.BlockSpec((tb, ts), lambda i, j: (i, j)),
            ),
            compiler_params=params,
            cost_estimate=pl.CostEstimate(
                flops=3 * n_elem,
                transcendentals=n_elem,
                bytes_accessed=in_bytes + out_bytes),
        )(x3)
        e = out[0, :b * s] if swapped else out[:b, :s]
        return e.reshape(b, *spatial)

    # 'mean' / 'sum': one scalar partial per (i, j) block, broadcast into a
    # sublane/lane-aligned (8, 128) output tile; summed outside the kernel.
    out_bytes = nb * ns * _SUBLANE * _LANE * 4
    partial = pl.pallas_call(
        functools.partial(_entropy_block_sum_kernel, eps=eps),
        out_shape=jax.ShapeDtypeStruct((nb * _SUBLANE, ns * _LANE), jnp.float32),
        grid_spec=pltpu.PrefetchScalarGridSpec(
            num_scalar_prefetch=0,
            grid=(nb, ns),
            in_specs=[in_spec],
            out_specs=pl.BlockSpec((_SUBLANE, _LANE), lambda i, j: (i, j)),
        ),
        compiler_params=params,
        cost_estimate=pl.CostEstimate(
            flops=3 * n_elem,
            transcendentals=n_elem,
            bytes_accessed=in_bytes + out_bytes),
    )(x3)

    total = jnp.sum(partial[::_SUBLANE, ::_LANE])  # (nb, ns) scalars
    if reduction == "mean":
        total = total / float(count)
    return total.astype(x.dtype)


def _entropy_ref(x, reduction="mean", eps=1e-16):
    x = jnp.asarray(x, jnp.float32)
    e = -(x * jnp.log(x + eps))
    e = e.sum(axis=1)
    if reduction == "mean":
        return e.mean()
    elif reduction == "sum":
        return e.sum()
    return e


if __name__ == "__main__":
    key = jax.random.PRNGKey(0)
    ok = True

    # NCHW-like input consistent with the module: (batch=2, channels=4, 16, 16)
    logits = jax.random.normal(key, (2, 4, 16, 16), dtype=jnp.float32)
    x = jax.nn.softmax(logits, axis=1)            # probability-like over channels

    out_mean = jax.block_until_ready(entropy(x, reduction="mean"))
    ref_mean = _entropy_ref(x, reduction="mean")
    ok &= bool(jnp.allclose(out_mean, ref_mean, rtol=1e-5, atol=1e-5))

    out_sum = jax.block_until_ready(entropy(x, reduction="sum"))
    ref_sum = _entropy_ref(x, reduction="sum")
    ok &= bool(jnp.allclose(out_sum, ref_sum, rtol=1e-5, atol=1e-4))

    out_none = jax.block_until_ready(entropy(x, reduction="none"))
    ref_none = _entropy_ref(x, reduction="none")
    ok &= out_none.shape == (2, 16, 16)
    ok &= bool(jnp.allclose(out_none, ref_none, rtol=1e-5, atol=1e-5))

    # Classification-shaped (B, C) input exercises the small-S lane remap.
    logits2 = jax.random.normal(jax.random.PRNGKey(1), (16, 10), dtype=jnp.float32)
    x2 = jax.nn.softmax(logits2, axis=1)

    out2_mean = jax.block_until_ready(entropy(x2, reduction="mean"))
    ok &= bool(jnp.allclose(out2_mean, _entropy_ref(x2, "mean"), rtol=1e-5, atol=1e-5))

    out2_none = jax.block_until_ready(entropy(x2, reduction="none"))
    ok &= out2_none.shape == (16,)
    ok &= bool(jnp.allclose(out2_none, _entropy_ref(x2, "none"), rtol=1e-5, atol=1e-5))

    if ok:
        print("KERNEL_OK")
    else:
        raise SystemExit("mismatch vs reference")
</pallas_src>

<mosaic_0001>
module attributes {stable_mosaic.version = 11 : i64} {
  func.func @_entropy_block_sum_kernel(%arg0: i32, %arg1: i32, %arg2: memref<2x4x256xf32, #tpu.memory_space<vmem>>, %arg3: memref<8x128xf32, #tpu.memory_space<vmem>>) attributes {dimension_semantics = [#tpu.dimension_semantics<parallel>, #tpu.dimension_semantics<parallel>], iteration_bounds = array<i64: 1, 1>, scalar_prefetch = 0 : i64, scratch_operands = 0 : i64, tpu.core_type = #tpu.core_type<tc>, window_params = [{transform_indices = @transform_0, window_bounds = array<i64: 2, 4, 256>}, {transform_indices = @transform_1, window_bounds = array<i64: 8, 128>}]} {
    %c0 = arith.constant 0 : index
    %c0_0 = arith.constant 0 : index
    %c0_1 = arith.constant 0 : index
    %0 = vector.load %arg2[%c0, %c0_0, %c0_1] : memref<2x4x256xf32, #tpu.memory_space<vmem>>, vector<2x4x256xf32>
    %cst = arith.constant 1.000000e-16 : f32
    %1 = vector.broadcast %cst : f32 to vector<2x4x256xf32>
    %2 = arith.addf %0, %1 : vector<2x4x256xf32>
    %3 = math.log %2 : vector<2x4x256xf32>
    %4 = arith.mulf %0, %3 : vector<2x4x256xf32>
    %5 = vector.shape_cast %4 : vector<2x4x256xf32> to vector<1x2x4x256xf32>
    %cst_2 = arith.constant dense<0.000000e+00> : vector<1xf32>
    %6 = vector.multi_reduction <add>, %5, %cst_2 [1, 2, 3] : vector<1x2x4x256xf32> to vector<1xf32>
    %7 = vector.shape_cast %6 : vector<1xf32> to vector<1x1x1x1xf32>
    %8 = vector.extract %7[0, 0, 0, 0] : f32 from vector<1x1x1x1xf32>
    %cst_3 = arith.constant 0.000000e+00 : f32
    %9 = arith.subf %cst_3, %8 : f32
    %10 = vector.broadcast %9 : f32 to vector<8x128xf32>
    %c0_4 = arith.constant 0 : index
    %c0_5 = arith.constant 0 : index
    %11 = vector.load %arg3[%c0_4, %c0_5] : memref<8x128xf32, #tpu.memory_space<vmem>>, vector<8x128xf32>
    tpu.vector_store %arg3[%c0_4, %c0_5], %10 {strides = array<i32>} : memref<8x128xf32, #tpu.memory_space<vmem>>, vector<8x128xf32>,
    return
  }
  func.func @transform_0(%arg0: i32, %arg1: i32) -> (i32, i32, i32) {
    %c0_i32 = arith.constant 0 : i32
    %c0_i32_0 = arith.constant 0 : i32
    return %arg0, %c0_i32, %arg1 : i32, i32, i32
  }
  func.func @transform_1(%arg0: i32, %arg1: i32) -> (i32, i32) {
    %c0_i32 = arith.constant 0 : i32
    return %arg0, %arg1 : i32, i32
  }
}

</mosaic_0001>

<bundles_post_ra>
// kernel: tpu_custom_call.1
= control target key start
LH: loop header
LB: loop body
LE: loop exit
PB: predicated region body
PF: predicated region fallthrough
CT: control target
= control target key end

     0   :  { %6 = vsyncpa [#allocation3], 0  ;;  %s148_s0 = inlined_call_operand.hbm [shape: f32[2,4,256], index: 0, kind: input, shape index: {}]   ;;  %s149_s1 = inlined_call_operand.hbm [shape: f32[8,128], index: 1, kind: output, shape index: {}]  }
   0x1   :  { %7 = vsyncpa [#allocation4], 0  ;;  %s128_s6 = smov [#allocation2]  }
   0x2   :  { %s13_s7 = sshll.u32 %s128_s6, 4  ;;  %s14_s7 = int_to_ptr.vmem [resolvable:$true] %s13_s7 }
   0x3   :  { %s92_s8 = scalar_lea.vmem %s14_s7, 256  ;;  %p97_p1 = scmp.lt.s32.totalorder %s14_s7, %s14_s7 }
   0x4   :  { %p93_p0 = scmp.ne.s32.totalorder %s14_s7, %s92_s8  ;;  %p98_p2 = scmp.lt.s32.totalorder %s92_s8, %s92_s8 }
   0x6   :  { %p99_p3 = por %p98_p2, %p97_p1 }
   0x8   :  { %p100_p4 = pnand %p99_p3, %p93_p0 }
   0xa   :  { %103 = shalt.err (!%p100_p4)
}
   0xb   :  { %s129_s9 = smov 128   ;;  %s130_s10 = smov 8  }
   0xc   :  { %19 = dma.hbm_to_vmem [thread:$0]  %s148_s0, 256, %s14_s7, [#allocation3], %s129_s9, %s129_s9, %s130_s10  }
   0xd   :  { %124 = dma.done.wait [#allocation3], 256  }
   0xe   :  { %125 = vsyncadd [#allocation3], 4294967040  ;;  %v23_v0 = vld [vmem:[#allocation2] sm:$0xff]  ;;  %v24_v1 = vld [vmem:[#allocation2 + $0x8] sm:$0xff]  ;;  %vm39_vm0 = vcmask 1043456   ;;  %s131_s0 = smov [#allocation5]  }
   0xf   :  { %v25_v2 = vadd.f32 1e-16, %v23_v0  ;;  %v26_v3 = vadd.f32 1e-16, %v24_v1  ;;  %s65_s13 = sshll.u32 %s131_s0, 4  ;;  %s66_s13 = int_to_ptr.vmem [resolvable:$true] %s65_s13 }
  0x10   :  { %s104_s16 = scalar_lea.vmem %s66_s13, 128  ;;  %p109_p6 = scmp.lt.s32.totalorder %s66_s13, %s66_s13 }
  0x11   :  { %80 = vlog2.f32 %v25_v2  ;;  %p105_p5 = scmp.ne.s32.totalorder %s66_s13, %s104_s16  ;;  %p110_p7 = scmp.lt.s32.totalorder %s104_s16, %s104_s16 }
  0x12   :  { %82 = vlog2.f32 %v26_v3 }
  0x13   :  { %p111_p8 = por %p110_p7, %p109_p6 }
  0x15   :  { %p112_p9 = pnand %p111_p8, %p105_p5 }
  0x1e   :  { %v81_v4 = vpop.eup %80 }
  0x1f   :  { %v83_v5 = vpop.eup %82  ;;  %v28_v6 = vmul.f32 0.6931472, %v81_v4 }
  0x20   :  { %v30_v7 = vmul.f32 0.6931472, %v83_v5 }
  0x21   :  { %v31_v8 = vmul.f32 %v28_v6, %v23_v0 }
  0x22   :  { %v32_v9 = vmul.f32 %v30_v7, %v24_v1 }
  0x23   :  { %v35_v10 = vcombine.high %v31_v8, %v31_v8  ;;  %v40_v11 = vsel %vm39_vm0, %v31_v8, 0.0 }
  0x24   :  { %v36_v12 = vcombine.high %v32_v9, %v32_v9  ;;  %v43_v14 = vsel %vm39_vm0, %v32_v9, 0.0 }
  0x25   :  { %v41_v13 = vsel %vm39_vm0, %v35_v10, 0.0 }
  0x26   :  { %v42_v15 = vadd.f32 %v41_v13, %v40_v11  ;;  %v45_v16 = vsel %vm39_vm0, %v36_v12, 0.0 }
  0x28   :  { %v44_v17 = vadd.f32 %v43_v14, %v42_v15 }
  0x2a   :  { %v46_v18 = vadd.f32 %v45_v16, %v44_v17 }
  0x2c   :  { %47 = vadd.xlane.f32.xlu0 %v46_v18 }
  0xb5   :  { %v48_v19 = vpop.xlane.xlu0 %47 }
  0xb6   :  { %v49_v20 = vrot.slane %v48_v19, 4 }
  0xb8   :  { %v50_v21 = vadd.f32 %v49_v20, %v48_v19 }
  0xba   :  { %v51_v22 = vrot.slane %v50_v21, 2 }
  0xbc   :  { %v52_v23 = vadd.f32 %v51_v22, %v50_v21 }
  0xbe   :  { %v53_v24 = vrot.slane %v52_v23, 1 }
  0xc0   :  { %v54_v25 = vadd.f32 %v53_v24, %v52_v23 }
  0xc2   :  { %74 = vpush %v54_v25 }
  0xf3   :  { %s75_s14 = spop %74 }
  0xf4   :  { %s56_s15 = ssub.f32 0.0, %s75_s14 }
  0xf6   :  { %v57_v26 = vstv %s56_s15 }
  0xf7   :  { %58 = vst [vmem:[#allocation5] sm:$0xff] %v57_v26 }
  0xf8   :  { %115 = shalt.err (!%p112_p9)
}
  0xf9   :  { %68 = dma.vmem_to_hbm [thread:$0]  %s66_s13, 128, %s149_s1, [#allocation4]  }
  0xfa   :  { %126 = dma.done.wait [#allocation4], 128  }
  0xfb   :  { %127 = vsyncadd [#allocation4], 4294967168 }
  0xfc   :  { %72 = vsyncpa [#allocation3], 1 }
  0xfd   :  { %73 = vsyncpa [#allocation4], 1 }

</bundles_post_ra>
